<compile_context>
chip_gen: v7x
topology: tpu7x:2x2x1
jax: 0.10.0
libtpu: 0.0.40
codegen_flags: <defaults>
</compile_context>

<pallas_src>
import math

import jax
import jax.numpy as jnp
import numpy as np
from jax.experimental import pallas as pl
from jax.experimental.pallas import tpu as pltpu


def _make_gcn_kernel(Bb, N, NFG, NFR, inv_sqrt_nfr, mxu_dtype, with_rel,
                     ln_eps=1e-5):
    rows = Bb * N

    def kernel(pen_ref, x_ref, wt_ref, bt_ref, wp_ref, bp_ref, wg_ref,
               gam_ref, bet_ref, out_ref, *maybe_rel_ref):
        g = pl.program_id(1)

        # Head-sum accumulator lives directly in the resident f32 output
        # block (block index constant along the head axis, so the HBM
        # writeback happens exactly once per batch tile, after the last head).
        @pl.when(g == 0)
        def _():
            out_ref[...] = jnp.zeros_like(out_ref)

        # ---- per-head work (head = inner "arbitrary" grid axis) ----------
        # N is padded to the sublane tile in the wrapper, so these reshapes
        # never cross an (8,128) tile boundary: they are free views.
        x3 = x_ref[...]                              # (Bb, N, NFG) mxu dtype
        x2 = x3.reshape(rows, NFG)
        wt = wt_ref[0]                               # (NFG, NFR) mxu dtype
        wp = wp_ref[0]
        wg = wg_ref[0]                               # (NFG, NFG) mxu dtype

        theta = jnp.dot(x2, wt, preferred_element_type=jnp.float32) + bt_ref[0]
        phi = jnp.dot(x2, wp, preferred_element_type=jnp.float32) + bp_ref[0]

        # Scaled similarity + additive position mask.  theta/phi are kept in
        # f32 here so the returned relation graph stays close to the
        # reference softmax; this matmul is tiny (N x N x NFR per element).
        sim = jnp.einsum('bnr,bmr->bnm',
                         theta.reshape(Bb, N, NFR), phi.reshape(Bb, N, NFR),
                         preferred_element_type=jnp.float32)
        sim = sim * inv_sqrt_nfr + pen_ref[...]

        # Softmax over the last dim.  The diagonal (distance 0) is never
        # masked, so every row keeps a finite entry.  Exact reciprocal for
        # parity with the reference (EUP-approx was flagged in review).
        sim = sim - jnp.max(sim, axis=-1, keepdims=True)
        e = jnp.exp(sim)
        rel = e / jnp.sum(e, axis=-1, keepdims=True)   # (Bb, N, N) f32

        # relation_graph @ features, then the bias-free GCN linear.
        agg = jnp.einsum('bnm,bmf->bnf', rel.astype(mxu_dtype), x3,
                         preferred_element_type=jnp.float32)
        one = jnp.dot(agg.reshape(rows, NFG).astype(mxu_dtype), wg,
                      preferred_element_type=jnp.float32)  # (rows, NFG) f32

        # LayerNorm over NFG (+affine) + ReLU.  mean and E[x^2] are two
        # independent cross-lane reductions (var = E[x^2] - mu^2), so there
        # is no dependent (x - mu) pass before the second XLU reduction.
        mu = jnp.mean(one, axis=-1, keepdims=True)
        msq = jnp.mean(one * one, axis=-1, keepdims=True)
        var = jnp.maximum(msq - mu * mu, 0.0)
        y = (one - mu) * jax.lax.rsqrt(var + ln_eps)
        y = jnp.maximum(y * gam_ref[0] + bet_ref[0], 0.0)

        out_ref[...] += y.reshape(Bb, N, NFG)

        if with_rel:
            # Only the last head's relation graph is returned (PyTorch loop).
            @pl.when(g == pl.num_programs(1) - 1)
            def _():
                maybe_rel_ref[0][...] = rel

    return kernel


def _pick_batch_tile(B, N, NFG, feat_itemsize, target_rows=512,
                     tile_budget_bytes=24 << 20):
    """Pick Bb (batch elements per grid step).

    Goals (perf review): (a) Bb*N rows ~ 512 so per-grid-step overhead is
    amortized and the MXU M dimension is fed, (b) keep >= 2 batch tiles so
    the "parallel" batch axis can split across v7x's two TensorCores,
    (c) keep the double-buffered feature + output tiles inside a VMEM budget
    that is safe on every generation (v7x has only 64 MiB per TensorCore)."""
    def tile_bytes(d):
        r = d * N
        return 2 * r * NFG * feat_itemsize + 3 * r * NFG * 4

    candidates = [d for d in range(1, B + 1)
                  if B % d == 0
                  and tile_bytes(d) <= tile_budget_bytes
                  and (B // d >= 2 or B < 2)]
    if not candidates:
        return 1
    for d in candidates:
        if d * N >= target_rows:
            return d
    return candidates[-1]


def _vmem_limit_bytes(Bb, N, NFG, NFR, mxu_itemsize, with_rel):
    """Explicit scoped-VMEM budget from the actual block sizes."""
    f32 = 4
    blocks = (Bb * N * N * f32                        # penalty mask
              + Bb * N * NFG * mxu_itemsize           # features
              + 2 * NFG * NFR * mxu_itemsize          # W_theta^T, W_phi^T (1 head)
              + NFG * NFG * mxu_itemsize              # W_gcn^T (1 head)
              + (2 * NFR + 2 * NFG) * f32             # biases + LN affine
              + Bb * N * NFG * f32                    # summed-head output
              + (Bb * N * N * f32 if with_rel else 0))
    total = 2 * blocks                                # double-buffered pipeline
    # +25% headroom for compiler temporaries; floor at the v6e/v7x default
    # (32 MiB) and clamp to the smallest physical VMEM (v7x: 64 MiB / TC).
    return int(min(max(int(total * 1.25), 32 << 20), 64 << 20))


def gcn_module_forward(features, boxes_in_flat, params, cfg, *,
                       mxu_dtype=jnp.bfloat16, return_relation_graph=True):
    """GCN_Module.forward.

    features:      [B, N, NFG] float32   (B = batch * frames)
    boxes_in_flat: [B*N, 4]    float32   (x1, y1, x2, y2)
    Returns (sum of per-head outputs [B, N, NFG] f32,
             last head's relation graph [B, N, N] f32 or None).
    """
    B, N, NFG = features.shape
    NFR = cfg["num_features_relation"]
    NG = cfg["num_graph"]
    OH, OW = cfg["out_size"]
    pos_threshold = cfg["pos_threshold"]
    mxu_dtype = jnp.dtype(mxu_dtype)

    # ---- box centers -----------------------------------------------------
    cx = (boxes_in_flat[:, 0] + boxes_in_flat[:, 2]) * 0.5
    cy = (boxes_in_flat[:, 1] + boxes_in_flat[:, 3]) * 0.5
    pos_c = jnp.stack([cx, cy], axis=-1).reshape(B, N, 2).astype(jnp.float32)
    dist2_thresh = float((pos_threshold * OW) ** 2)

    # ---- pad N to the sublane tile (8 rows f32, 16 rows bf16) so in-kernel
    # reshapes stay zero-cost views.  Padded boxes: far-away centers (always
    # masked vs. real boxes) + zero features -> contribute exactly 0. -------
    pad_mult = 8 if mxu_dtype.itemsize >= 4 else 16
    Np = ((N + pad_mult - 1) // pad_mult) * pad_mult
    feats = features.astype(jnp.float32)
    if Np != N:
        pad = Np - N
        feats = jnp.pad(feats, ((0, 0), (0, pad), (0, 0)))
        pos_c = jnp.pad(pos_c, ((0, 0), (0, pad), (0, 0)),
                        constant_values=1.0e8)
    feats = feats.astype(mxu_dtype)   # features only feed MXU operands

    # ---- head-invariant additive position penalty, computed once here.
    # Single [B, Np, Np] block; its index is constant along the head grid
    # axis so it is DMA'd once per batch tile (replaces two lane-sparse
    # center streams + per-head in-kernel relayouts). -----------------------
    diff = pos_c[:, :, None, :] - pos_c[:, None, :, :]
    dist2 = jnp.sum(diff * diff, axis=-1)
    penalty = jnp.where(dist2 > dist2_thresh, -1e30, 0.0).astype(jnp.float32)

    # ---- weights: pre-transpose to [in, out] (no in-kernel .T) and pre-cast
    # the MXU operands (halves weight HBM bytes for bf16). ------------------
    wt = jnp.transpose(params["w_theta"], (0, 2, 1)).astype(mxu_dtype)
    wp = jnp.transpose(params["w_phi"], (0, 2, 1)).astype(mxu_dtype)
    wg = jnp.transpose(params["w_gcn"], (0, 2, 1)).astype(mxu_dtype)
    bt = params["b_theta"].astype(jnp.float32)       # (NG, 1, NFR)
    bp = params["b_phi"].astype(jnp.float32)
    gamma = params["ln_gamma"].astype(jnp.float32)   # (NG, 1, NFG)
    beta = params["ln_beta"].astype(jnp.float32)

    Bb = _pick_batch_tile(B, Np, NFG, mxu_dtype.itemsize)
    grid = (B // Bb, NG)   # heads innermost -> per-head weights prefetched

    kernel = _make_gcn_kernel(Bb, Np, NFG, NFR, 1.0 / math.sqrt(NFR),
                              mxu_dtype, return_relation_graph)

    batch_map = lambda b, g: (b, 0, 0)   # constant along g: fetched once/tile
    head_map = lambda b, g: (g, 0, 0)    # varies along g: double-buffered

    out_shapes = [jax.ShapeDtypeStruct((B, Np, NFG), jnp.float32)]
    out_specs = [pl.BlockSpec((Bb, Np, NFG), batch_map)]
    if return_relation_graph:
        out_shapes.append(jax.ShapeDtypeStruct((B, Np, Np), jnp.float32))
        out_specs.append(pl.BlockSpec((Bb, Np, Np), batch_map))

    vmem_limit = _vmem_limit_bytes(Bb, Np, NFG, NFR, mxu_dtype.itemsize,
                                   return_relation_graph)

    flops = 2 * B * NG * (2 * Np * NFG * NFR + Np * Np * NFR
                          + Np * Np * NFG + Np * NFG * NFG)
    transcendentals = B * NG * (Np * Np + Np)
    w_bytes = ((2 * NFG * NFR + NFG * NFG) * mxu_dtype.itemsize
               + (2 * NFR + 2 * NFG) * 4)
    bytes_accessed = (B * Np * NFG * (mxu_dtype.itemsize + 4)   # feats in, out
                      + B * Np * Np * 4                          # penalty
                      + (B * Np * Np * 4 if return_relation_graph else 0)
                      + (B // Bb) * NG * w_bytes)                # weight restream

    results = pl.pallas_call(
        kernel,
        out_shape=tuple(out_shapes),
        grid_spec=pltpu.PrefetchScalarGridSpec(
            num_scalar_prefetch=0,
            grid=grid,
            in_specs=[
                pl.BlockSpec((Bb, Np, Np), batch_map),    # position penalty
                pl.BlockSpec((Bb, Np, NFG), batch_map),   # features
                pl.BlockSpec((1, NFG, NFR), head_map),    # W_theta^T (head g)
                pl.BlockSpec((1, 1, NFR), head_map),      # b_theta
                pl.BlockSpec((1, NFG, NFR), head_map),    # W_phi^T
                pl.BlockSpec((1, 1, NFR), head_map),      # b_phi
                pl.BlockSpec((1, NFG, NFG), head_map),    # W_gcn^T (no bias)
                pl.BlockSpec((1, 1, NFG), head_map),      # LayerNorm gamma
                pl.BlockSpec((1, 1, NFG), head_map),      # LayerNorm beta
            ],
            out_specs=out_specs,
        ),
        compiler_params=pltpu.CompilerParams(
            dimension_semantics=("parallel", "arbitrary"),
            vmem_limit_bytes=vmem_limit),
        cost_estimate=pl.CostEstimate(flops=flops,
                                      transcendentals=transcendentals,
                                      bytes_accessed=int(bytes_accessed)),
    )(penalty, feats, wt, bt, wp, bp, wg, gamma, beta)

    if return_relation_graph:
        out_p, rel_p = results
        return out_p[:, :N, :], rel_p[:, :N, :N]
    (out_p,) = results
    return out_p[:, :N, :], None


def gcn_module_reference(features, boxes_in_flat, params, cfg,
                         mxu_dtype=jnp.float32):
    """Pure-JAX reference mirroring the PyTorch forward.  `mxu_dtype`
    optionally applies the same operand casts as the kernel so the bf16
    kernel can be checked against an identically-quantized reference."""
    B, N, NFG = features.shape
    NFR = cfg["num_features_relation"]
    NG = cfg["num_graph"]
    OH, OW = cfg["out_size"]
    pos_threshold = cfg["pos_threshold"]
    hp = jax.lax.Precision.HIGHEST

    cx = (boxes_in_flat[:, 0] + boxes_in_flat[:, 2]) / 2.0
    cy = (boxes_in_flat[:, 1] + boxes_in_flat[:, 3]) / 2.0
    pos = jnp.stack([cx, cy], axis=-1).reshape(B, N, 2)
    dist = jnp.sqrt(jnp.sum((pos[:, :, None, :] - pos[:, None, :, :]) ** 2,
                            axis=-1))
    position_mask = dist > pos_threshold * OW

    x_m = features.astype(mxu_dtype)
    outs, rel = [], None
    for i in range(NG):
        w_t = params["w_theta"][i].astype(mxu_dtype)
        w_p = params["w_phi"][i].astype(mxu_dtype)
        w_g = params["w_gcn"][i].astype(mxu_dtype)
        theta = jnp.einsum("bnf,rf->bnr", x_m, w_t,
                           preferred_element_type=jnp.float32,
                           precision=hp) + params["b_theta"][i][0]
        phi = jnp.einsum("bnf,rf->bnr", x_m, w_p,
                         preferred_element_type=jnp.float32,
                         precision=hp) + params["b_phi"][i][0]
        sim = jnp.einsum("bnr,bmr->bnm", theta, phi,
                         preferred_element_type=jnp.float32,
                         precision=hp) / np.sqrt(NFR)
        sim = jnp.where(position_mask, -jnp.inf, sim)
        rel = jax.nn.softmax(sim, axis=2)
        agg = jnp.einsum("bnm,bmf->bnf", rel.astype(mxu_dtype), x_m,
                         preferred_element_type=jnp.float32, precision=hp)
        one = jnp.einsum("bnf,gf->bng", agg.astype(mxu_dtype), w_g,
                         preferred_element_type=jnp.float32, precision=hp)
        mu = jnp.mean(one, axis=-1, keepdims=True)
        var = jnp.mean((one - mu) ** 2, axis=-1, keepdims=True)
        one = (one - mu) / jnp.sqrt(var + 1e-5)
        one = one * params["ln_gamma"][i][0] + params["ln_beta"][i][0]
        outs.append(jax.nn.relu(one))
    return sum(outs), rel


if __name__ == "__main__":
    cfg = {
        "num_features_relation": 16,
        "num_graph": 2,
        "num_boxes": 8,
        "num_frames": 2,
        "num_features_gcn": 32,
        "out_size": (16, 16),
        "pos_threshold": 0.2,
        "dataset_name": "collective",   # non-volleyball -> LayerNorm([NFG])
    }
    B = 2                               # batch * frames
    NFG = cfg["num_features_gcn"]
    NFR = cfg["num_features_relation"]
    NG = cfg["num_graph"]
    OH, OW = cfg["out_size"]

    key = jax.random.PRNGKey(0)
    kp, kd = jax.random.split(key)
    pk = jax.random.split(kp, 5)
    scale = 0.1
    params = {
        "w_theta": scale * jax.random.normal(pk[0], (NG, NFR, NFG), jnp.float32),
        "b_theta": scale * jax.random.normal(pk[1], (NG, 1, NFR), jnp.float32),
        "w_phi":   scale * jax.random.normal(pk[2], (NG, NFR, NFG), jnp.float32),
        "b_phi":   scale * jax.random.normal(pk[3], (NG, 1, NFR), jnp.float32),
        "w_gcn":   scale * jax.random.normal(pk[4], (NG, NFG, NFG), jnp.float32),
        "ln_gamma": jnp.ones((NG, 1, NFG), jnp.float32),
        "ln_beta":  jnp.zeros((NG, 1, NFG), jnp.float32),
    }

    def make_inputs(k, n_boxes):
        k0, k1, k2 = jax.random.split(k, 3)
        feats = jax.random.normal(k0, (B, n_boxes, NFG), jnp.float32)
        xy1 = jax.random.uniform(k1, (B * n_boxes, 2), minval=0.0,
                                 maxval=OW * 0.8)
        wh = jax.random.uniform(k2, (B * n_boxes, 2), minval=0.5,
                                maxval=OW * 0.2)
        boxes = jnp.concatenate([xy1, xy1 + wh], axis=-1).astype(jnp.float32)
        return feats, boxes

    # ---- run 1: default bf16 MXU operands, N = 8.  Checked against a
    # reference applying the identical bf16 operand casts (f32 accumulate),
    # so the comparison stays tight despite the reduced-precision matmuls. --
    feats8, boxes8 = make_inputs(kd, 8)
    out_k, rel_k = gcn_module_forward(feats8, boxes8, params, cfg)
    out_k = jax.block_until_ready(out_k)
    rel_k = jax.block_until_ready(rel_k)
    out_r, rel_r = gcn_module_reference(feats8, boxes8, params, cfg,
                                        mxu_dtype=jnp.bfloat16)
    np.testing.assert_allclose(np.asarray(out_k), np.asarray(out_r),
                               rtol=2e-3, atol=2e-3)
    np.testing.assert_allclose(np.asarray(rel_k), np.asarray(rel_r),
                               rtol=2e-3, atol=2e-3)

    # ---- run 2: full-f32 MXU path vs. exact f32 reference. ----------------
    out_k32, rel_k32 = gcn_module_forward(feats8, boxes8, params, cfg,
                                          mxu_dtype=jnp.float32)
    out_k32 = jax.block_until_ready(out_k32)
    out_r32, rel_r32 = gcn_module_reference(feats8, boxes8, params, cfg,
                                            mxu_dtype=jnp.float32)
    np.testing.assert_allclose(np.asarray(out_k32), np.asarray(out_r32),
                               rtol=2e-2, atol=2e-2)
    np.testing.assert_allclose(np.asarray(rel_k32), np.asarray(rel_r32),
                               rtol=2e-2, atol=2e-2)

    # ---- run 3: N not a multiple of the sublane tile exercises the
    # wrapper-side padding path (bf16 default -> pads 6 -> 16). -------------
    cfg6 = dict(cfg, num_boxes=6)
    feats6, boxes6 = make_inputs(jax.random.PRNGKey(1), 6)
    out_k6, rel_k6 = gcn_module_forward(feats6, boxes6, params, cfg6)
    out_k6 = jax.block_until_ready(out_k6)
    rel_k6 = jax.block_until_ready(rel_k6)
    out_r6, rel_r6 = gcn_module_reference(feats6, boxes6, params, cfg6,
                                          mxu_dtype=jnp.bfloat16)
    np.testing.assert_allclose(np.asarray(out_k6), np.asarray(out_r6),
                               rtol=2e-3, atol=2e-3)
    np.testing.assert_allclose(np.asarray(rel_k6), np.asarray(rel_r6),
                               rtol=2e-3, atol=2e-3)

    print("KERNEL_OK")
</pallas_src>

<mosaic_0001>
module attributes {stable_mosaic.version = 11 : i64} {
  func.func @kernel(%arg0: i32, %arg1: i32, %arg2: memref<1x16x16xf32, #tpu.memory_space<vmem>>, %arg3: memref<1x16x32xbf16, #tpu.memory_space<vmem>>, %arg4: memref<1x32x16xbf16, #tpu.memory_space<vmem>>, %arg5: memref<1x1x16xf32, #tpu.memory_space<vmem>>, %arg6: memref<1x32x16xbf16, #tpu.memory_space<vmem>>, %arg7: memref<1x1x16xf32, #tpu.memory_space<vmem>>, %arg8: memref<1x32x32xbf16, #tpu.memory_space<vmem>>, %arg9: memref<1x1x32xf32, #tpu.memory_space<vmem>>, %arg10: memref<1x1x32xf32, #tpu.memory_space<vmem>>, %arg11: memref<1x16x32xf32, #tpu.memory_space<vmem>>, %arg12: memref<1x16x16xf32, #tpu.memory_space<vmem>>) attributes {dimension_semantics = [#tpu.dimension_semantics<parallel>, #tpu.dimension_semantics<arbitrary>], iteration_bounds = array<i64: 2, 2>, scalar_prefetch = 0 : i64, scratch_operands = 0 : i64, tpu.core_type = #tpu.core_type<tc>, window_params = [{transform_indices = @transform_0, window_bounds = array<i64: 1, 16, 16>}, {transform_indices = @transform_1, window_bounds = array<i64: 1, 16, 32>}, {transform_indices = @transform_2, window_bounds = array<i64: 1, 32, 16>}, {transform_indices = @transform_3, window_bounds = array<i64: 1, 1, 16>}, {transform_indices = @transform_4, window_bounds = array<i64: 1, 32, 16>}, {transform_indices = @transform_5, window_bounds = array<i64: 1, 1, 16>}, {transform_indices = @transform_6, window_bounds = array<i64: 1, 32, 32>}, {transform_indices = @transform_7, window_bounds = array<i64: 1, 1, 32>}, {transform_indices = @transform_8, window_bounds = array<i64: 1, 1, 32>}, {transform_indices = @transform_9, window_bounds = array<i64: 1, 16, 32>}, {transform_indices = @transform_10, window_bounds = array<i64: 1, 16, 16>}]} {
    %c0_i32 = arith.constant 0 : i32
    %0 = arith.cmpi eq, %arg1, %c0_i32 : i32
    %1 = arith.extui %0 : i1 to i32
    %c0_i32_0 = arith.constant 0 : i32
    %2 = arith.cmpi ne, %1, %c0_i32_0 : i32
    scf.if %2 {
      %cst_48 = arith.constant 0.000000e+00 : f32
      %79 = vector.broadcast %cst_48 : f32 to vector<1x16x32xf32>
      %c0_49 = arith.constant 0 : index
      %c0_50 = arith.constant 0 : index
      %c0_51 = arith.constant 0 : index
      %80 = vector.load %arg11[%c0_49, %c0_50, %c0_51] : memref<1x16x32xf32, #tpu.memory_space<vmem>>, vector<1x16x32xf32>
      tpu.vector_store %arg11[%c0_49, %c0_50, %c0_51], %79 {strides = array<i32>} : memref<1x16x32xf32, #tpu.memory_space<vmem>>, vector<1x16x32xf32>,
    } else {
    }
    %c0 = arith.constant 0 : index
    %c0_1 = arith.constant 0 : index
    %c0_2 = arith.constant 0 : index
    %3 = vector.load %arg3[%c0, %c0_1, %c0_2] : memref<1x16x32xbf16, #tpu.memory_space<vmem>>, vector<1x16x32xbf16>
    %4 = vector.shape_cast %3 : vector<1x16x32xbf16> to vector<16x32xbf16>
    %c0_3 = arith.constant 0 : index
    %c0_4 = arith.constant 0 : index
    %c0_5 = arith.constant 0 : index
    %5 = vector.load %arg4[%c0_3, %c0_4, %c0_5] : memref<1x32x16xbf16, #tpu.memory_space<vmem>>, vector<1x32x16xbf16>
    %6 = vector.shape_cast %5 : vector<1x32x16xbf16> to vector<32x16xbf16>
    %c0_6 = arith.constant 0 : index
    %c0_7 = arith.constant 0 : index
    %c0_8 = arith.constant 0 : index
    %7 = vector.load %arg6[%c0_6, %c0_7, %c0_8] : memref<1x32x16xbf16, #tpu.memory_space<vmem>>, vector<1x32x16xbf16>
    %8 = vector.shape_cast %7 : vector<1x32x16xbf16> to vector<32x16xbf16>
    %c0_9 = arith.constant 0 : index
    %c0_10 = arith.constant 0 : index
    %c0_11 = arith.constant 0 : index
    %9 = vector.load %arg8[%c0_9, %c0_10, %c0_11] : memref<1x32x32xbf16, #tpu.memory_space<vmem>>, vector<1x32x32xbf16>
    %10 = vector.shape_cast %9 : vector<1x32x32xbf16> to vector<32x32xbf16>
    %cst = arith.constant dense<0.000000e+00> : vector<16x16xf32>
    %11 = tpu.matmul %4, %6, %cst {dimension_numbers = #tpu.dot_dimension_numbers<[1], [0], [0], [1], [0, 0, 1, 1], [], []>} : vector<16x32xbf16>, vector<32x16xbf16>, vector<16x16xf32> -> vector<16x16xf32>
    %c0_12 = arith.constant 0 : index
    %c0_13 = arith.constant 0 : index
    %c0_14 = arith.constant 0 : index
    %12 = vector.load %arg5[%c0_12, %c0_13, %c0_14] : memref<1x1x16xf32, #tpu.memory_space<vmem>>, vector<1x1x16xf32>
    %13 = vector.shape_cast %12 : vector<1x1x16xf32> to vector<1x16xf32>
    %14 = vector.broadcast %13 : vector<1x16xf32> to vector<16x16xf32>
    %15 = arith.addf %11, %14 : vector<16x16xf32>
    %cst_15 = arith.constant dense<0.000000e+00> : vector<16x16xf32>
    %16 = tpu.matmul %4, %8, %cst_15 {dimension_numbers = #tpu.dot_dimension_numbers<[1], [0], [0], [1], [0, 0, 1, 1], [], []>} : vector<16x32xbf16>, vector<32x16xbf16>, vector<16x16xf32> -> vector<16x16xf32>
    %c0_16 = arith.constant 0 : index
    %c0_17 = arith.constant 0 : index
    %c0_18 = arith.constant 0 : index
    %17 = vector.load %arg7[%c0_16, %c0_17, %c0_18] : memref<1x1x16xf32, #tpu.memory_space<vmem>>, vector<1x1x16xf32>
    %18 = vector.shape_cast %17 : vector<1x1x16xf32> to vector<1x16xf32>
    %19 = vector.broadcast %18 : vector<1x16xf32> to vector<16x16xf32>
    %20 = arith.addf %16, %19 : vector<16x16xf32>
    %21 = vector.shape_cast %15 : vector<16x16xf32> to vector<1x16x16xf32>
    %22 = vector.shape_cast %20 : vector<16x16xf32> to vector<1x16x16xf32>
    "tpu.trace_start"() <{level = 10 : i32, message = "bnr,bmr->bnm"}> : () -> ()
    %cst_19 = arith.constant dense<0.000000e+00> : vector<1x16x16xf32>
    %23 = tpu.matmul %21, %22, %cst_19 {dimension_numbers = #tpu.dot_dimension_numbers<[2], [2], [1], [1], [0, 0, 0, 1, 1, 1], [0], [0]>} : vector<1x16x16xf32>, vector<1x16x16xf32>, vector<1x16x16xf32> -> vector<1x16x16xf32>
    "tpu.trace_stop"() : () -> ()
    %cst_20 = arith.constant 2.500000e-01 : f32
    %24 = vector.broadcast %cst_20 : f32 to vector<1x16x16xf32>
    %25 = arith.mulf %23, %24 : vector<1x16x16xf32>
    %c0_21 = arith.constant 0 : index
    %c0_22 = arith.constant 0 : index
    %c0_23 = arith.constant 0 : index
    %26 = vector.load %arg2[%c0_21, %c0_22, %c0_23] : memref<1x16x16xf32, #tpu.memory_space<vmem>>, vector<1x16x16xf32>
    %27 = arith.addf %25, %26 : vector<1x16x16xf32>
    %cst_24 = arith.constant dense<0xFF800000> : vector<1x16xf32>
    %28 = vector.multi_reduction <maximumf>, %27, %cst_24 [2] : vector<1x16x16xf32> to vector<1x16xf32>
    %29 = vector.shape_cast %28 : vector<1x16xf32> to vector<1x16x1xf32>
    %30 = vector.broadcast %29 : vector<1x16x1xf32> to vector<1x16x16xf32>
    %31 = arith.subf %27, %30 : vector<1x16x16xf32>
    %32 = math.exp %31 : vector<1x16x16xf32>
    %cst_25 = arith.constant dense<0.000000e+00> : vector<1x16xf32>
    %33 = vector.multi_reduction <add>, %32, %cst_25 [2] : vector<1x16x16xf32> to vector<1x16xf32>
    %34 = vector.shape_cast %33 : vector<1x16xf32> to vector<1x16x1xf32>
    %35 = vector.broadcast %34 : vector<1x16x1xf32> to vector<1x16x16xf32>
    %36 = arith.divf %32, %35 : vector<1x16x16xf32>
    %37 = arith.truncf %36 : vector<1x16x16xf32> to vector<1x16x16xbf16>
    "tpu.trace_start"() <{level = 10 : i32, message = "bnm,bmf->bnf"}> : () -> ()
    %cst_26 = arith.constant dense<0.000000e+00> : vector<1x16x32xf32>
    %38 = tpu.matmul %37, %3, %cst_26 {dimension_numbers = #tpu.dot_dimension_numbers<[2], [1], [1], [2], [0, 0, 0, 1, 1, 2], [0], [0]>} : vector<1x16x16xbf16>, vector<1x16x32xbf16>, vector<1x16x32xf32> -> vector<1x16x32xf32>
    "tpu.trace_stop"() : () -> ()
    %39 = vector.shape_cast %38 : vector<1x16x32xf32> to vector<16x32xf32>
    %40 = arith.truncf %39 : vector<16x32xf32> to vector<16x32xbf16>
    %cst_27 = arith.constant dense<0.000000e+00> : vector<16x32xf32>
    %41 = tpu.matmul %40, %10, %cst_27 {dimension_numbers = #tpu.dot_dimension_numbers<[1], [0], [0], [1], [0, 0, 1, 1], [], []>} : vector<16x32xbf16>, vector<32x32xbf16>, vector<16x32xf32> -> vector<16x32xf32>
    %cst_28 = arith.constant dense<0.000000e+00> : vector<16xf32>
    %42 = vector.multi_reduction <add>, %41, %cst_28 [1] : vector<16x32xf32> to vector<16xf32>
    %43 = vector.shape_cast %42 : vector<16xf32> to vector<16x1xf32>
    %cst_29 = arith.constant 3.200000e+01 : f32
    %44 = vector.broadcast %cst_29 : f32 to vector<16x1xf32>
    %45 = arith.divf %43, %44 : vector<16x1xf32>
    %46 = arith.mulf %41, %41 : vector<16x32xf32>
    %cst_30 = arith.constant dense<0.000000e+00> : vector<16xf32>
    %47 = vector.multi_reduction <add>, %46, %cst_30 [1] : vector<16x32xf32> to vector<16xf32>
    %48 = vector.shape_cast %47 : vector<16xf32> to vector<16x1xf32>
    %cst_31 = arith.constant 3.200000e+01 : f32
    %49 = vector.broadcast %cst_31 : f32 to vector<16x1xf32>
    %50 = arith.divf %48, %49 : vector<16x1xf32>
    %51 = arith.mulf %45, %45 : vector<16x1xf32>
    %52 = arith.subf %50, %51 : vector<16x1xf32>
    %cst_32 = arith.constant 0.000000e+00 : f32
    %53 = vector.broadcast %cst_32 : f32 to vector<16x1xf32>
    %54 = arith.maximumf %52, %53 : vector<16x1xf32>
    %55 = vector.broadcast %45 : vector<16x1xf32> to vector<16x32xf32>
    %56 = arith.subf %41, %55 : vector<16x32xf32>
    %cst_33 = arith.constant 9.99999974E-6 : f32
    %57 = vector.broadcast %cst_33 : f32 to vector<16x1xf32>
    %58 = arith.addf %54, %57 : vector<16x1xf32>
    %59 = math.rsqrt %58 : vector<16x1xf32>
    %60 = vector.broadcast %59 : vector<16x1xf32> to vector<16x32xf32>
    %61 = arith.mulf %56, %60 : vector<16x32xf32>
    %c0_34 = arith.constant 0 : index
    %c0_35 = arith.constant 0 : index
    %c0_36 = arith.constant 0 : index
    %62 = vector.load %arg9[%c0_34, %c0_35, %c0_36] : memref<1x1x32xf32, #tpu.memory_space<vmem>>, vector<1x1x32xf32>
    %63 = vector.shape_cast %62 : vector<1x1x32xf32> to vector<1x32xf32>
    %64 = vector.broadcast %63 : vector<1x32xf32> to vector<16x32xf32>
    %65 = arith.mulf %61, %64 : vector<16x32xf32>
    %c0_37 = arith.constant 0 : index
    %c0_38 = arith.constant 0 : index
    %c0_39 = arith.constant 0 : index
    %66 = vector.load %arg10[%c0_37, %c0_38, %c0_39] : memref<1x1x32xf32, #tpu.memory_space<vmem>>, vector<1x1x32xf32>
    %67 = vector.shape_cast %66 : vector<1x1x32xf32> to vector<1x32xf32>
    %68 = vector.broadcast %67 : vector<1x32xf32> to vector<16x32xf32>
    %69 = arith.addf %65, %68 : vector<16x32xf32>
    %cst_40 = arith.constant 0.000000e+00 : f32
    %70 = vector.broadcast %cst_40 : f32 to vector<16x32xf32>
    %71 = arith.maximumf %69, %70 : vector<16x32xf32>
    %c0_41 = arith.constant 0 : index
    %c0_42 = arith.constant 0 : index
    %c0_43 = arith.constant 0 : index
    %72 = vector.load %arg11[%c0_41, %c0_42, %c0_43] : memref<1x16x32xf32, #tpu.memory_space<vmem>>, vector<1x16x32xf32>
    %73 = vector.shape_cast %71 : vector<16x32xf32> to vector<1x16x32xf32>
    %74 = arith.addf %72, %73 : vector<1x16x32xf32>
    %c0_44 = arith.constant 0 : index
    %c0_45 = arith.constant 0 : index
    %c0_46 = arith.constant 0 : index
    %75 = vector.load %arg11[%c0_44, %c0_45, %c0_46] : memref<1x16x32xf32, #tpu.memory_space<vmem>>, vector<1x16x32xf32>
    tpu.vector_store %arg11[%c0_44, %c0_45, %c0_46], %74 {strides = array<i32>} : memref<1x16x32xf32, #tpu.memory_space<vmem>>, vector<1x16x32xf32>,
    %c1_i32 = arith.constant 1 : i32
    %76 = arith.cmpi eq, %arg1, %c1_i32 : i32
    %77 = arith.extui %76 : i1 to i32
    %c0_i32_47 = arith.constant 0 : i32
    %78 = arith.cmpi ne, %77, %c0_i32_47 : i32
    scf.if %78 {
      %c0_48 = arith.constant 0 : index
      %c0_49 = arith.constant 0 : index
      %c0_50 = arith.constant 0 : index
      %79 = vector.load %arg12[%c0_48, %c0_49, %c0_50] : memref<1x16x16xf32, #tpu.memory_space<vmem>>, vector<1x16x16xf32>
      tpu.vector_store %arg12[%c0_48, %c0_49, %c0_50], %36 {strides = array<i32>} : memref<1x16x16xf32, #tpu.memory_space<vmem>>, vector<1x16x16xf32>,
    } else {
    }
    return
  }
  func.func @transform_0(%arg0: i32, %arg1: i32) -> (i32, i32, i32) {
    %c0_i32 = arith.constant 0 : i32
    %c0_i32_0 = arith.constant 0 : i32
    %c0_i32_1 = arith.constant 0 : i32
    return %arg0, %c0_i32, %c0_i32_0 : i32, i32, i32
  }
  func.func @transform_1(%arg0: i32, %arg1: i32) -> (i32, i32, i32) {
    %c0_i32 = arith.constant 0 : i32
    %c0_i32_0 = arith.constant 0 : i32
    %c0_i32_1 = arith.constant 0 : i32
    return %arg0, %c0_i32, %c0_i32_0 : i32, i32, i32
  }
  func.func @transform_2(%arg0: i32, %arg1: i32) -> (i32, i32, i32) {
    %c0_i32 = arith.constant 0 : i32
    %c0_i32_0 = arith.constant 0 : i32
    %c0_i32_1 = arith.constant 0 : i32
    return %arg1, %c0_i32, %c0_i32_0 : i32, i32, i32
  }
  func.func @transform_3(%arg0: i32, %arg1: i32) -> (i32, i32, i32) {
    %c0_i32 = arith.constant 0 : i32
    %c0_i32_0 = arith.constant 0 : i32
    %c0_i32_1 = arith.constant 0 : i32
    return %arg1, %c0_i32, %c0_i32_0 : i32, i32, i32
  }
  func.func @transform_4(%arg0: i32, %arg1: i32) -> (i32, i32, i32) {
    %c0_i32 = arith.constant 0 : i32
    %c0_i32_0 = arith.constant 0 : i32
    %c0_i32_1 = arith.constant 0 : i32
    return %arg1, %c0_i32, %c0_i32_0 : i32, i32, i32
  }
  func.func @transform_5(%arg0: i32, %arg1: i32) -> (i32, i32, i32) {
    %c0_i32 = arith.constant 0 : i32
    %c0_i32_0 = arith.constant 0 : i32
    %c0_i32_1 = arith.constant 0 : i32
    return %arg1, %c0_i32, %c0_i32_0 : i32, i32, i32
  }
  func.func @transform_6(%arg0: i32, %arg1: i32) -> (i32, i32, i32) {
    %c0_i32 = arith.constant 0 : i32
    %c0_i32_0 = arith.constant 0 : i32
    %c0_i32_1 = arith.constant 0 : i32
    return %arg1, %c0_i32, %c0_i32_0 : i32, i32, i32
  }
  func.func @transform_7(%arg0: i32, %arg1: i32) -> (i32, i32, i32) {
    %c0_i32 = arith.constant 0 : i32
    %c0_i32_0 = arith.constant 0 : i32
    %c0_i32_1 = arith.constant 0 : i32
    return %arg1, %c0_i32, %c0_i32_0 : i32, i32, i32
  }
  func.func @transform_8(%arg0: i32, %arg1: i32) -> (i32, i32, i32) {
    %c0_i32 = arith.constant 0 : i32
    %c0_i32_0 = arith.constant 0 : i32
    %c0_i32_1 = arith.constant 0 : i32
    return %arg1, %c0_i32, %c0_i32_0 : i32, i32, i32
  }
  func.func @transform_9(%arg0: i32, %arg1: i32) -> (i32, i32, i32) {
    %c0_i32 = arith.constant 0 : i32
    %c0_i32_0 = arith.constant 0 : i32
    %c0_i32_1 = arith.constant 0 : i32
    return %arg0, %c0_i32, %c0_i32_0 : i32, i32, i32
  }
  func.func @transform_10(%arg0: i32, %arg1: i32) -> (i32, i32, i32) {
    %c0_i32 = arith.constant 0 : i32
    %c0_i32_0 = arith.constant 0 : i32
    %c0_i32_1 = arith.constant 0 : i32
    return %arg0, %c0_i32, %c0_i32_0 : i32, i32, i32
  }
}

</mosaic_0001>

<bundles_post_ra>
// kernel: tpu_custom_call.1
= control target key start
LH: loop header
LB: loop body
LE: loop exit
PB: predicated region body
PF: predicated region fallthrough
CT: control target
= control target key end

     0   :  { %s1876_s0 = inlined_call_operand.vmem [shape: f32[2,16,16], index: 0, kind: input, shape index: {}]   ;;  %s1877_s1 = inlined_call_operand.vmem [shape: bf16[2,16,32], index: 1, kind: input, shape index: {}]   ;;  %s1878_s2 = inlined_call_operand.vmem [shape: bf16[2,32,16], index: 2, kind: input, shape index: {}]   ;;  %s1879_s3 = inlined_call_operand.vmem [shape: f32[2,1,16], index: 3, kind: input, shape index: {}]   ;;  %s1880_s4 = inlined_call_operand.vmem [shape: bf16[2,32,16], index: 4, kind: input, shape index: {}]   ;;  %s1881_s5 = inlined_call_operand.vmem [shape: f32[2,1,16], index: 5, kind: input, shape index: {}]   ;;  %s1882_s6 = inlined_call_operand.vmem [shape: bf16[2,32,32], index: 6, kind: input, shape index: {}]   ;;  %s1883_s7 = inlined_call_operand.vmem [shape: f32[2,1,32], index: 7, kind: input, shape index: {}]   ;;  %s1884_s8 = inlined_call_operand.vmem [shape: f32[2,1,32], index: 8, kind: input, shape index: {}]   ;;  %s1885_s9 = inlined_call_operand.hbm [shape: f32[2,16,32], index: 9, kind: output, shape index: {0}]   ;;  %s1886_s10 = inlined_call_operand.hbm [shape: f32[2,16,16], index: 10, kind: output, shape index: {1}]  }
   0x1   :  { %1902 = sst [smem:[#allocation20_spill]] %s1876_s0 }
   0x2   :  { %1903 = sst [smem:[#allocation21_spill]] %s1877_s1 }
   0x3   :  { %1904 = sst [smem:[#allocation22_spill]] %s1885_s9 }
   0x4   :  { %1905 = sst [smem:[#allocation23_spill]] %s1886_s10 }
   0x5   :  { %16 = vsyncpa [#allocation3], 0 }
   0x6   :  { %18 = vsyncpa [#allocation3 + $0x1], 0 }
   0x7   :  { %19 = vsyncpa [#allocation5], 0 }
   0x8   :  { %21 = vsyncpa [#allocation5 + $0x1], 0  ;;  %s1577_s13 = smov 0   ;;  %s1579_s14 = smov 0  }
   0x9   :  { %s1581_s15 = smov 0   ;;  %s1583_s16 = smov 0  }
   0xa   :  { %s1585_s17 = smov 0   ;;  %s1587_s18 = smov 0  }
   0xb   :  { %s1589_s19 = smov 0   ;;  %s1591_s20 = smov 0  }
   0xc LB: > { %1906 = sst [smem:[#allocation8_spill]] %s1485_s13  ;;  %s1176_s21 = sadd.s32 4294967295, %s1513_s20   ;;  %s1513_s20 = sphi %s1591_s20, %s27_s20   ;;  %s1509_s19 = sphi %s1589_s19, %s1938_s19   ;;  %s1505_s18 = sphi %s1587_s18, %s1937_s18   ;;  %s1501_s17 = sphi %s1585_s17, %s1936_s17   ;;  %s1497_s16 = sphi %s1583_s16, %s1935_s16   ;;  %s1493_s15 = sphi %s1581_s15, %s1934_s15   ;;  %s1489_s14 = sphi %s1579_s14, %s1933_s14   ;;  %s1485_s13 = sphi %s1577_s13, %s1932_s13  }
   0xd   : > { %1907 = sst [smem:[#allocation9_spill]] %s1489_s14  ;;  %s1177_s22 = sadd.s32 4294967294, %s1513_s20  }
   0xe   : > { %1908 = sst [smem:[#allocation10_spill]] %s1493_s15  ;;  %s36_s23 = sadd.s32 1, %s1505_s18 }
   0xf   : > { %1909 = sst [smem:[#allocation11_spill]] %s1505_s18  ;;  %p37_p0 = scmp.ge.s32.totalorder %s36_s23, 2 }
  0x10   : > { %1910 = sst [smem:[#allocation12_spill]] %s1509_s19  ;;  %s39_s24 = sadd.s32 1, %s1509_s19 }
  0x11   : > { %1911 = sst [smem:[#allocation13_spill]] %s1513_s20  ;;  %p290_p1 = scmp.ne.s32.totalorder %s1493_s15, %s1489_s14 }
  0x12   : > { %p291_p2 = scmp.eq.s32.totalorder %s1176_s21, 3  ;;  %s1940_s23 = smov (%p37_p0, %s36_s23), 0 }
  0x13   : > { %1912 = sst [smem:[#allocation14_spill]] %s1940_s23  ;;  %s1942_s24 = smov (!%p37_p0, %s39_s24), %s1509_s19 }
  0x14   : > { %p1626_p3 = por %p291_p2, %p290_p1  ;;  %p296_p4 = scmp.ne.s32.totalorder %s1489_s14, %s1485_s13 }
  0x15   : > { %p41_p5 = scmp.ge.s32.totalorder %s1942_s24, 2  ;;  %p297_p6 = scmp.eq.s32.totalorder %s1177_s22, 3 }
  0x16   : > { %s1913_s25 = scalar_select %p1626_p3, 1, 0 }
  0x17   : > { %p1180_p7 = scmp.ge.s32.totalorder %s1513_s20, 1  ;;  %p405_p8 = scmp.lt.s32.totalorder %s1513_s20, 5 }
  0x18   : > { %1914 = sst [smem:[#allocation15_spill]] %s1913_s25  ;;  %s1944_s24 = smov (%p41_p5, %s1942_s24), 0 }
  0x19   : > { %1915 = sst [smem:[#allocation16_spill]] %s1944_s24  ;;  %p1636_p9 = por %p297_p6, %p296_p4 }
  0x1a   : > { %p406_p10 = pnand %p1180_p7, %p405_p8  ;;  %s277_s27 = ssub.s32 %s1509_s19, %s1944_s24 }
  0x1b   : > { %s1916_s26 = scalar_select %p1636_p9, 1, 0 }
  0x1c   : > { %s280_s28 = sadd.s32 1, %s1493_s15  ;;  %p278_p11 = scmp.eq.s32.totalorder %s277_s27, 0 }
  0x1d   : > { %1917 = sst [smem:[#allocation17_spill]] %s1916_s26  ;;  %409 = sbr.rel (%p406_p10) target bundleno = 1485 (0x5cd), region = 56 }
  0x1e   : > { %s1644_s29 = scalar_select %p278_p11, %s1493_s15, %s280_s28  }
  0x20   : > { %1918 = sst [smem:[#allocation18_spill]] %s1644_s29 }
  0x24   : > { %s1647_s30 = sand.u32 1, %s1489_s14   ;;  %p480_p12 = scmp.lt.s32.totalorder %s1501_s17, 1 }
  0x25   : > { %1919 = sst [smem:[#allocation19_spill]] %s1647_s30  ;;  %s1181_s11 = sshll.u32 %s1647_s30, 4 }
  0x26   : > { %p490_p13 = scmp.lt.s32.totalorder %s1497_s16, 1  ;;  %s1920_s0 = sld [smem:[#allocation20_spill]] }
  0x27   : > { %s481_s12 = scalar_select %p480_p12, %s1501_s17, 1 }
  0x28   : > { %s1654_s21 = scalar_select %p490_p13, %s1497_s16, 1 }
  0x29   : > { %s1222_s22 = sshll.u32 %s481_s12, 4  ;;  %s1223_s27 = sshll.u32 %s481_s12, 3 }
  0x2a   : > { %s1921_s1 = sld [smem:[#allocation21_spill]]  ;;  %s1224_s15 = sshll.u32 %s1654_s21, 4 }
  0x2b   : > { %s494_s9 = scalar_lea.vmem %s1878_s2, %s1224_s15  ;;  %s502_s30 = scalar_lea.vmem %s1880_s4, %s1224_s15 }
  0x2c   : > { %s1659_s23 = scalar_lea.vmem %s1920_s0, %s1222_s22  ;;  %s505_s28 = scalar_lea.vmem %s1881_s5, %s1654_s21 }
  0x2d   : > { %s1682_s19 = scalar_lea.vmem %s1882_s6, %s1224_s15  ;;  %s513_s26 = scalar_lea.vmem %s1883_s7, %s1654_s21 }
  0x2e   : > { %s516_s20 = scalar_lea.vmem %s1884_s8, %s1654_s21  ;;  %s1694_s25 = scalar_lea.vmem [#allocation4], %s1181_s11 }
  0x2f   : > { %p1193_p0 = scmp.ne.s32.totalorder %s1497_s16, 0 }
  0x30   : > { %s489_s29 = scalar_lea.vmem %s1921_s1, %s1223_s27  ;;  %s1692_s1 = scalar_lea.vmem [#allocation2], %s1181_s11  ;;  %vm522_vm0 = vcmask (!%p1193_p0), 261120   ;;  %v1515_v0 = vmov (!%p1193_p0), 0.0  }
  0x31   : > { %521 = sbr.rel (%p1193_p0) target bundleno = 56 (0x38), region = 60  ;;  %523 = vst.msk [vmem:[%s1692_s1] sm:$0xff] (!%p1193_p0), %vm522_vm0, %v1515_v0  ;;  %524 = vst.msk [vmem:[%s1692_s1 + $0x8] sm:$0xff] (!%p1193_p0), %vm522_vm0, %v1515_v0 }
  0x38 PF: > { %v1368_v1 = vld [vmem:[%s502_s30] sm:$0xff]   ;;  %v1516_v2 = vmov 0.0   ;;  %v1369_v3 = vld [vmem:[%s502_s30 + $0x8] sm:$0xff]   ;;  %vm1517_vm1 = vmmov 0   ;;  %vm563_vm2 = vcmask 261120   ;;  %vm668_vm3 = vcmask 130048  }
  0x39   : > { %1252 = vmatprep.subr.bf16.mxu1 %v1516_v2  ;;  %1244 = vmatprep.subr.bf16.mxu0 %v1516_v2  ;;  %v1371_v4 = vld [vmem:[%s494_s9] sm:$0xff]   ;;  %v1372_v6 = vld [vmem:[%s494_s9 + $0x8] sm:$0xff]   ;;  %vm1282_vm4 = vmpackc.low %vm668_vm3, %vm668_vm3  ;;  %p1213_p1 = scmp.ne.s32.totalorder %s1497_s16, 1 }
  0x3a   : > { %1253 = vmatpush3.bf16.msra.mxu1 %v1368_v1  ;;  %1256 = vmatprep.mubr.msk.bf16.mxu1 %vm1517_vm1, %v1516_v2  ;;  %v1370_v5 = vld [vmem:[%s489_s29] sm:$0xff]   ;;  %s1922_s29 = scalar_lea.vmem %s1879_s3, %s1654_s21  ;;  %v759_v27 = vld [vmem:[%s1659_s23 + $0x8] sm:$0xff] }
  0x3b   : > { %1254 = vmatprep.subr.bf16.mxu1 %v1516_v2  ;;  %1248 = vmatprep.mubr.msk.bf16.mxu0 %vm1517_vm1, %v1516_v2  ;;  %v1199_v7 = vld [vmem:[%s505_s28] ss:$0 sm:$0xff]  ;;  %v1374_v50 = vld [vmem:[%s1682_s19 + $0x8] sm:$0xff]  }
  0x3c   : > { %1245 = vmatpush3.bf16.msra.mxu0 %v1371_v4  ;;  %v1194_v10 = vld [vmem:[%s1922_s29] ss:$0 sm:$0xff] }
  0x3d   : > { %1246 = vmatprep.subr.bf16.mxu0 %v1516_v2  ;;  %v758_v24 = vld [vmem:[%s1659_s23] sm:$0xff] }
  0x3e   : > { %1255 = vmatpush3.bf16.msra.mxu1 %v1369_v3  ;;  %v1373_v42 = vld [vmem:[%s1682_s19] sm:$0xff]  }
  0x40   : > { %1247 = vmatpush3.bf16.msra.mxu0 %v1372_v6 }
  0x41   : > { %1257 = vmatmul.mubr.msk.bf16.vlgmr.msra.gmra.mrb[0].mxu1 %vm563_vm2, %v1370_v5  ;;  %1273 = vmatprep.subr.bf16.mxu0 %v1516_v2 }
  0x43   : > { %1249 = vmatmul.mubr.msk.bf16.vlgmr.msra.gmra.mrb[0].mxu0 %vm563_vm2, %v1370_v5 }
  0x44   : > { %1277 = vmatprep.mubr.msk.bf16.mxu0 %vm1517_vm1, %v1516_v2  ;;  %1274 = vmatpush3.bf16.msra.mxu0 %v1373_v42 }
  0x45   : > { %1275 = vmatprep.subr.bf16.mxu0 %v1516_v2 }
  0x48   : > { %1276 = vmatpush3.bf16.msra.mxu0 %v1374_v50 }
 0x114   : > { %v661_v8 = vpop.f32.mrb[0].mxu1 }
 0x115   : > { %v1258_v9 = vpop.f32.mrb[1].mxu1  ;;  %v662_v12 = vadd.f32 %v1199_v7, %v661_v8 }
 0x116   : > { %v664_v11 = vpop.f32.mrb[2].mxu1  ;;  %v601_v15 = vpop.f32.mrb[0].mxu0 }
 0x117   : > { %v665_v13 = vadd.f32 %v1199_v7, %v664_v11  ;;  %v1259_v14 = vpop.f32.mrb[3].mxu1  ;;  %v602_v16 = vadd.f32 %v1194_v10, %v601_v15  ;;  %v1250_v17 = vpop.f32.mrb[1].mxu0 }
 0x118   : > { %v604_v19 = vpop.f32.mrb[2].mxu0 }
 0x119   : > { %v1281_v18 = vpack.c.bf16 %v665_v13, %v662_v12  ;;  %v1251_v20 = vpop.f32.mrb[3].mxu0  ;;  %1264 = vmatprep.mubr.msk.f32.mxu1 %vm668_vm3, %v602_v16  ;;  %v605_v21 = vadd.f32 %v1194_v10, %v604_v19 }
 0x11a   : > { %v1211_v20 = vld [vmem:[%s513_s26] ss:$0 sm:$0xff] }
 0x11b   : > { %1283 = vmatprep.subr.msk.bf16.mxu1 %vm1282_vm4, %v1281_v18 }
 0x11c   : > { %1286 = vmatpush3.bf16.xpose.msk.msra.mxu1 %vm1282_vm4, %v1281_v18 }
 0x11d   : > { %1267 = vmatprep.subr.bf16.mxu1 %v1516_v2 }
 0x123   : > { %1265 = vmatmul.mubr.msk.f32.vlgmr.msra.gmra.mrb[4].mxu1 %vm668_vm3, %v605_v21 }
 0x124   : > { %1268 = vmatpush3.bf16.msra.mxu1 %v1370_v5  ;;  %1269 = vmatprep.mubr.msk.bf16.mxu1 %vm1517_vm1, %v1516_v2 }
 0x1f6   : > { %v1266_v22 = vpop.f32.mrb[4].mxu1 }
 0x1f7   : > { %v747_v23 = vpop.f32.mrb[5].mxu1  ;;  %v757_v25 = vmul.f32 0.25, %v1266_v22 }
 0x1f8   : > { %v756_v26 = vmul.f32 0.25, %v747_v23 }
 0x1f9   : > { %v761_v30 = vadd.f32 %v759_v27, %v757_v25 }
 0x1fa   : > { %v760_v28 = vadd.f32 %v758_v24, %v756_v26  ;;  %v1212_v24 = vld [vmem:[%s516_s20] ss:$0 sm:$0xff] }
 0x1fb   : > { %v765_v31 = vsel %vm668_vm3, %v761_v30, -inf }
 0x1fc   : > { %v762_v29 = vsel %vm668_vm3, %v760_v28, -inf }
 0x1fd   : > { %763 = vmax.xlane.f32.xlu0 %v762_v29  ;;  %v940_v29 = vld [vmem:[%s1692_s1] sm:$0xff] }
 0x201   : > { %766 = vmax.xlane.f32.xlu0 %v765_v31 }
 0x28a   : > { %v764_v32 = vpop.xlane.xlu0 %763 }
 0x28b   : > { %v768_v33 = vsub.f32 %v760_v28, %v764_v32  ;;  %v941_v32 = vld [vmem:[%s1692_s1 + $0x8] sm:$0xff] }
 0x28d   : > { %v770_v34 = vmul.f32 1.442695, %v768_v33 }
 0x28e   : > { %v767_v35 = vpop.xlane.xlu0 %766 }
 0x28f   : > { %1375 = vpow2.f32 %v770_v34  ;;  %v769_v36 = vsub.f32 %v761_v30, %v767_v35 }
 0x291   : > { %v772_v37 = vmul.f32 1.442695, %v769_v36 }
 0x293   : > { %1377 = vpow2.f32 %v772_v37 }
 0x299   : > { %v1376_v38 = vpop.eup %1375 }
 0x29a   : > { %v774_v39 = vsel %vm668_vm3, %v1376_v38, 0.0 }
 0x29b   : > { %775 = vadd.xlane.f32.xlu1 %v774_v39 }
 0x29d   : > { %v1378_v40 = vpop.eup %1377 }
 0x29e   : > { %v777_v41 = vsel %vm668_vm3, %v1378_v40, 0.0 }
 0x29f   : > { %778 = vadd.xlane.f32.xlu1 %v777_v41 }
 0x328   : > { %v776_v43 = vpop.xlane.xlu1 %775 }
 0x329   : > { %1379 = vrcp.f32 %v776_v43 }
 0x32c   : > { %v779_v44 = vpop.xlane.xlu1 %778 }
 0x32d   : > { %1381 = vrcp.f32 %v779_v44 }
 0x333   : > { %v1380_v45 = vpop.eup %1379 }
 0x334   : > { %v1737_v47 = vmul.f32 %v1380_v45, %v1376_v38 }
 0x336   : > { %950 = vst.msk [vmem:[%s1694_s25] sm:$0xff] (!%p1213_p1), %vm668_vm3, %v1737_v47 }
 0x337   : > { %v1382_v46 = vpop.eup %1381 }
 0x338   : > { %v1739_v48 = vmul.f32 %v1382_v46, %v1378_v40 }
 0x33a   : > { %v784_v49 = vpack.c.bf16 %v1739_v48, %v1737_v47  ;;  %951 = vst.msk [vmem:[%s1694_s25 + $0x8] sm:$0xff] (!%p1213_p1), %vm668_vm3, %v1739_v48 }
 0x33c   : > { %1270 = vmatmul.mubr.msk.bf16.vlgmr.msra.gmra.mrb[8].mxu1 %vm668_vm3, %v784_v49 }
 0x40f   : > { %v823_v51 = vpop.f32.mrb[8].mxu1 }
 0x410   : > { %v1271_v52 = vpop.f32.mrb[9].mxu1 }
 0x411   : > { %v826_v53 = vpop.f32.mrb[10].mxu1 }
 0x412   : > { %v830_v54 = vpack.c.bf16 %v826_v53, %v823_v51  ;;  %v1272_v55 = vpop.f32.mrb[11].mxu1 }
 0x414   : > { %1278 = vmatmul.mubr.msk.bf16.vlgmr.msra.gmra.mrb[4].mxu0 %vm563_vm2, %v830_v54 }
 0x4e7   : > { %v880_v56 = vpop.f32.mrb[4].mxu0 }
 0x4e8   : > { %v1279_v57 = vpop.f32.mrb[5].mxu0  ;;  %v887_v58 = vsel %vm563_vm2, %v880_v56, 0.0  ;;  %v896_v59 = vmul.f32 %v880_v56, %v880_v56 }
 0x4e9   : > { %888 = vadd.xlane.f32.xlu0 %v887_v58  ;;  %v883_v60 = vpop.f32.mrb[6].mxu0 }
 0x4ea   : > { %v1280_v61 = vpop.f32.mrb[7].mxu0  ;;  %v890_v62 = vsel %vm563_vm2, %v883_v60, 0.0  ;;  %v897_v63 = vmul.f32 %v883_v60, %v883_v60  ;;  %v898_v0 = vsel %vm563_vm2, %v896_v59, 0.0 }
 0x4eb   : > { %891 = vadd.xlane.f32.xlu1 %v890_v62 }
 0x4ec   : > { %v901_v1 = vsel %vm563_vm2, %v897_v63, 0.0 }
 0x4ed   : > { %899 = vadd.xlane.f32.xlu0 %v898_v0 }
 0x4ef   : > { %902 = vadd.xlane.f32.xlu1 %v901_v1 }
 0x576   : > { %v889_v2 = vpop.xlane.xlu0 %888 }
 0x577   : > { %v894_v3 = vmul.f32 0.03125, %v889_v2 }
 0x578   : > { %v892_v4 = vpop.xlane.xlu1 %891 }
 0x579   : > { %v895_v5 = vmul.f32 0.03125, %v892_v4  ;;  %v906_v7 = vmul.f32 %v894_v3, %v894_v3  ;;  %v912_v18 = vsub.f32 %v880_v56, %v894_v3 }
 0x57a   : > { %v900_v6 = vpop.xlane.xlu0 %899 }
 0x57b   : > { %v904_v8 = vmul.f32 0.03125, %v900_v6  ;;  %v907_v10 = vmul.f32 %v895_v5, %v895_v5  ;;  %v913_v21 = vsub.f32 %v883_v60, %v895_v5 }
 0x57c   : > { %v903_v9 = vpop.xlane.xlu1 %902 }
 0x57d   : > { %v908_v11 = vsub.f32 %v904_v8, %v906_v7  ;;  %v905_v12 = vmul.f32 0.03125, %v903_v9 }
 0x57f   : > { %v910_v13 = vmax.f32 %v908_v11, 0.0  ;;  %v909_v14 = vsub.f32 %v905_v12, %v907_v10 }
 0x581   : > { %v914_v15 = vadd.f32 1e-05, %v910_v13  ;;  %v911_v16 = vmax.f32 %v909_v14, 0.0 }
 0x583   : > { %1383 = vrsqrt.f32 %v914_v15  ;;  %v915_v17 = vadd.f32 1e-05, %v911_v16 }
 0x585   : > { %1385 = vrsqrt.f32 %v915_v17 }
 0x58d   : > { %v1384_v19 = vpop.eup %1383 }
 0x58e   : > { %v918_v22 = vmul.f32 %v1384_v19, %v912_v18 }
 0x58f   : > { %v1386_v23 = vpop.eup %1385 }
 0x590   : > { %v927_v25 = vmul.f32 %v1211_v20, %v918_v22  ;;  %v919_v26 = vmul.f32 %v1386_v23, %v913_v21 }
 0x592   : > { %v936_v27 = vadd.f32 %v1212_v24, %v927_v25  ;;  %v928_v28 = vmul.f32 %v1211_v20, %v919_v26 }
 0x594   : > { %v938_v30 = vmax.f32 %v936_v27, 0.0  ;;  %v937_v31 = vadd.f32 %v1212_v24, %v928_v28  ;;  %949 = sbr.rel (%p1213_p1) target bundleno = 1435 (0x59b), region = 64 }
 0x596   : > { %v942_v33 = vadd.f32 %v940_v29, %v938_v30  ;;  %v939_v34 = vmax.f32 %v937_v31, 0.0 }
 0x598   : > { %944 = vst.msk [vmem:[%s1692_s1] sm:$0xff] %vm563_vm2, %v942_v33  ;;  %v943_v35 = vadd.f32 %v941_v32, %v939_v34 }
 0x59a   : > { %945 = vst.msk [vmem:[%s1692_s1 + $0x8] sm:$0xff] %vm563_vm2, %v943_v35 }
 0x59b PF: > { %s1923_s21 = sld [smem:[#allocation19_spill]]  ;;  %s1227_s22 = sshll.u32 %s1501_s17, 8 }
 0x59c   : > { %s1925_s16 = sld [smem:[#allocation22_spill]]  ;;  %s971_s14 = sshll.u32 %s1692_s1, 4  ;;  %s1782_s14 = int_to_ptr.vmem [resolvable:$true] %s971_s14 }
 0x59d   : > { %s1387_s10 = scalar_lea.vmem %s1782_s14, 256  ;;  %s1518_s20 = smov [#allocation2]  }
 0x59e   : > { %p1388_p2 = scmp.ne.s32.totalorder %s1782_s14, %s1387_s10  ;;  %s1391_s0 = sshll.u32 %s1518_s20, 4  ;;  %s1392_s0 = int_to_ptr.vmem [resolvable:$false] %s1391_s0 }
 0x59f   : > { %s1393_s13 = scalar_lea.vmem %s1392_s0, 512  ;;  %p1394_p6 = scmp.lt.s32.totalorder %s1782_s14, %s1392_s0 }
 0x5a0   : > { %p1389_p4 = pnand %p1388_p2, %p1626_p3  ;;  %p1395_p7 = scmp.lt.s32.totalorder %s1393_s13, %s1387_s10 }
 0x5a1   : > { %s953_s26 = scalar_lea.sflag [#allocation3], %s1923_s21 }
 0x5a2   : > { %s1926_s27 = smov %s1925_s16  ;;  %s1779_s19 = scalar_lea.hbm %s1925_s16, %s1227_s22 }
 0x5a3   : > { %p1390_p5 = pneg %p1389_p4  ;;  %p1396_p8 = por %p1395_p7, %p1394_p6 }
 0x5a5   : > { %p1397_p10 = pnand %p1396_p8, %p1390_p5 }
 0x5a7   : > { %1400 = shalt.err (!%p1397_p10)
}
 0x5a8   : > { %s1401_s1 = scalar_lea.hbm %s1779_s19, 256  ;;  %s1405_s29 = scalar_lea.hbm %s1926_s27, 512 }
 0x5a9   : > { %p1402_p11 = scmp.ne.s32.totalorder %s1779_s19, %s1401_s1  ;;  %p1406_p0 = scmp.lt.u32.totalorder %s1779_s19, %s1926_s27 }
 0x5aa   : > { %p1407_p1 = scmp.lt.u32.totalorder %s1405_s29, %s1401_s1  ;;  %p1409_p4 = scmp.lt.u32.totalorder %s1401_s1, %s1779_s19 }
 0x5ab   : > { %p1403_p12 = pnand %p1402_p11, %p1626_p3 }
 0x5ac   : > { %p1408_p2 = por %p1407_p1, %p1406_p0 }
 0x5ad   : > { %p1404_p13 = pneg %p1403_p12 }
 0x5ae   : > { %p1410_p5 = por %p1409_p4, %p1408_p2 }
 0x5b0   : > { %p1411_p6 = pnand %p1410_p5, %p1404_p13 }
 0x5b2   : > { %1414 = shalt.err (!%p1411_p6)
}
 0x5b3   : > { %s1519_s11 = smov 128   ;;  %s1520_s12 = smov 8  }
 0x5b4   : > { %1287 = dma.vmem_to_hbm [thread:$0]  (%p1626_p3), %s1782_s14, 256, %s1779_s19, %s953_s26, %s1519_s11, %s1519_s11, %s1520_s12  }
 0x5b5   : > { %s1927_s16 = sld [smem:[#allocation23_spill]]  ;;  %s987_s0 = sshll.u32 %s1694_s25, 4  ;;  %s1819_s0 = int_to_ptr.vmem [resolvable:$true] %s987_s0 }
 0x5b6   : > { %s958_s13 = scalar_lea.sflag [#allocation5], %s1923_s21  ;;  %s1415_s1 = scalar_lea.vmem %s1819_s0, 256 }
 0x5b7   : > { %p1416_p7 = scmp.ne.s32.totalorder %s1819_s0, %s1415_s1  ;;  %s1521_s9 = smov [#allocation4]  }
 0x5b8   : > { %s1419_s19 = sshll.u32 %s1521_s9, 4  ;;  %s1420_s19 = int_to_ptr.vmem [resolvable:$false] %s1419_s19 }
 0x5b9   : > { %p1417_p8 = pnand %p1416_p7, %p1626_p3  ;;  %s1421_s17 = scalar_lea.vmem %s1420_s19, 512 }
 0x5ba   : > { %p1422_p11 = scmp.lt.s32.totalorder %s1819_s0, %s1420_s19  ;;  %p1423_p12 = scmp.lt.s32.totalorder %s1421_s17, %s1415_s1 }
 0x5bb   : > { %s1928_s10 = smov %s1927_s16  ;;  %s1816_s20 = scalar_lea.hbm %s1927_s16, %s1227_s22 }
 0x5bc   : > { %p1418_p10 = pneg %p1417_p8  ;;  %p1424_p13 = por %p1423_p12, %p1422_p11 }
 0x5be   : > { %p1425_p0 = pnand %p1424_p13, %p1418_p10 }
 0x5c0   : > { %1428 = shalt.err (!%p1425_p0)
}
 0x5c1   : > { %s1429_s25 = scalar_lea.hbm %s1816_s20, 256  ;;  %s1433_s26 = scalar_lea.hbm %s1928_s10, 512 }
 0x5c2   : > { %p1430_p1 = scmp.ne.s32.totalorder %s1816_s20, %s1429_s25  ;;  %p1434_p5 = scmp.lt.u32.totalorder %s1816_s20, %s1928_s10 }
 0x5c3   : > { %p1435_p6 = scmp.lt.u32.totalorder %s1433_s26, %s1429_s25  ;;  %p1437_p8 = scmp.lt.u32.totalorder %s1429_s25, %s1816_s20 }
 0x5c4   : > { %p1431_p2 = pnand %p1430_p1, %p1626_p3 }
 0x5c5   : > { %p1436_p7 = por %p1435_p6, %p1434_p5 }
 0x5c6   : > { %p1432_p4 = pneg %p1431_p2 }
 0x5c7   : > { %p1438_p10 = por %p1437_p8, %p1436_p7 }
 0x5c9   : > { %p1439_p11 = pnand %p1438_p10, %p1432_p4 }
 0x5cb   : > { %1442 = shalt.err (!%p1439_p11)
}
 0x5cc   : > { %1288 = dma.vmem_to_hbm [thread:$0]  (%p1626_p3), %s1819_s0, 256, %s1816_s20, %s958_s13, %s1519_s11, %s1519_s11, %s1520_s12  }
 0x5cd PF: > { %s1929_s23 = sld [smem:[#allocation13_spill]]  ;;  %s1930_s30 = sld [smem:[#allocation8_spill]] }
 0x5d3   : > { %p1298_p12 = scmp.ge.s32.totalorder %s1929_s23, 2  ;;  %s1002_s18 = sand.u32 1, %s1930_s30  }
 0x5d4   : > { %s1003_s16 = scalar_lea.sflag [#allocation3], %s1002_s18 }
 0x5d5   : > { %p1292_p13 = pnand %p1298_p12, %p1636_p9 }
 0x5d7   : > { %1476 = dma.done.wait (!%p1292_p13), %s1003_s16, 256  }
 0x5d8   : > { %1478 = vsyncadd (!%p1292_p13), %s1003_s16, 4294967040  ;;  %s1012_s24 = scalar_lea.sflag [#allocation5], %s1002_s18 }
 0x5d9   : > { %1480 = dma.done.wait (!%p1292_p13), %s1012_s24, 256  }
 0x5da   : > { %1482 = vsyncadd (!%p1292_p13), %s1012_s24, 4294967040  ;;  %s27_s20 = sadd.s32 1, %s1929_s23   ;;  %s1932_s13 = sld [smem:[#allocation9_spill]] }
 0x5db   : > { %p24_p0 = scmp.ge.s32.totalorder %s27_s20, 6   ;;  %s1933_s14 = sld [smem:[#allocation10_spill]] }
 0x5dc   : > { %s1934_s15 = sld [smem:[#allocation18_spill]]  ;;  %s1935_s16 = sld [smem:[#allocation11_spill]] }
 0x5dd   : > { %s1936_s17 = sld [smem:[#allocation12_spill]]  ;;  %s1937_s18 = sld [smem:[#allocation14_spill]] }
 0x5de   : > { %s1938_s19 = sld [smem:[#allocation16_spill]]  ;;  %26 = sbr.rel (!%p24_p0) target bundleno = 12 (0xc), region = 140 }
 0x5e5   :  { %1017 = vsyncpa [#allocation3], 1 }
 0x5e6   :  { %1019 = vsyncpa [#allocation3 + $0x1], 1 }
 0x5e7   :  { %1020 = vsyncpa [#allocation5], 1 }
 0x5e8   :  { %1022 = vsyncpa [#allocation5 + $0x1], 1 }

</bundles_post_ra>
